<compile_context>
chip_gen: v7x
topology: tpu7x:2x2x1
jax: 0.10.0
libtpu: 0.0.40
codegen_flags: <defaults>
</compile_context>

<pallas_src>
import functools

import jax
import jax.numpy as jnp
from jax import lax
from jax.experimental import pallas as pl
from jax.experimental.pallas import tpu as pltpu


def _fc_bn_relu_dropout_kernel(x_ref, w_ref, b_ref, g_ref, be_ref, bits_ref,
                               o_ref, *, eps, keep_threshold, apply_dropout,
                               use_bf16_mxu):
    # ---- Linear: y = x @ W^T + b  (W kept in (H_tile, D) layout) ----
    x = x_ref[...]
    w = w_ref[...]
    if use_bf16_mxu:
        # bf16 MXU inputs, f32 accumulation (v6e/v7x MXU is bf16-oriented).
        x = x.astype(jnp.bfloat16)
        w = w.astype(jnp.bfloat16)
    y = lax.dot_general(x, w, (((1,), (1,)), ((), ())),
                        preferred_element_type=jnp.float32)
    y = y + b_ref[...]                                   # (N, tn) + (1, tn)

    # ---- BatchNorm1d, training-mode biased batch stats (single pass) ----
    inv_n = 1.0 / y.shape[0]
    s1 = jnp.sum(y, axis=0, keepdims=True)               # (1, tn)
    s2 = jnp.sum(y * y, axis=0, keepdims=True)           # (1, tn)
    mean = s1 * inv_n
    var = jnp.maximum(s2 * inv_n - mean * mean, 0.0)     # guard cancellation
    z = (y - mean) * lax.rsqrt(var + eps)
    # Dropout scale 1/(1-p) is pre-folded into g_ref / be_ref by the wrapper.
    z = z * g_ref[...] + be_ref[...]

    # ---- ReLU ----
    z = jnp.maximum(z, 0.0)

    # ---- Dropout (inverted; integer-threshold compare, no f32 converts) ----
    if apply_dropout:
        keep = bits_ref[...] < jnp.uint32(keep_threshold)
        z = jnp.where(keep, z, 0.0)

    o_ref[...] = z.astype(o_ref.dtype)


def _choose_tile_h(n, d, hpad, budget_bytes=24 * 1024 * 1024):
    """Largest lane-dense (multiple-of-128) H tile whose VMEM footprint fits."""
    for tn in (2048, 1024, 512, 256, 128):
        if tn > hpad or hpad % tn:
            continue
        # f32 bytes: resident x (x2 buffers), weight tile (x2), bits + out
        # (x2 each), plus ~4 live (n, tn) f32 temporaries.
        est = 4 * (2 * n * d + 2 * tn * d + 4 * n * tn + 4 * n * tn)
        if est <= budget_bytes:
            return tn
    return 128


def fc_bn_relu_dropout(x, weight, bias, gamma, beta, dropout_key, *,
                       drop_p=0.5, eps=1e-5, use_bf16_mxu=True):
    """x: (N, D) f32; weight: (H, D) f32 (PyTorch Linear layout);
    bias/gamma/beta: (H,) f32.  Training-mode forward (batch stats + dropout).
    """
    N, D = x.shape
    H = weight.shape[0]

    # drop_p edge cases.
    if drop_p >= 1.0:
        return jnp.zeros((N, H), dtype=jnp.float32)
    apply_dropout = drop_p > 0.0
    scale = 1.0 / (1.0 - drop_p) if apply_dropout else 1.0
    keep_threshold = min(int(round((1.0 - drop_p) * (1 << 32))),
                         (1 << 32) - 1) if apply_dropout else (1 << 32) - 1

    # Pad H to a lane-dense multiple of 128 (zero weight/bias, unit gamma,
    # zero beta -> padded columns produce exactly 0 and are sliced off).
    Hpad = pl.cdiv(H, 128) * 128
    pad = Hpad - H
    w_p = jnp.pad(weight, ((0, pad), (0, 0)))
    b_p = jnp.pad(bias, (0, pad)).reshape(1, Hpad)
    g_p = jnp.pad(gamma * scale, (0, pad), constant_values=1.0).reshape(1, Hpad)
    be_p = jnp.pad(beta * scale, (0, pad)).reshape(1, Hpad)

    if apply_dropout:
        bits = jax.random.bits(dropout_key, (N, Hpad), dtype=jnp.uint32)
    else:
        bits = jnp.zeros((N, Hpad), dtype=jnp.uint32)

    tn = _choose_tile_h(N, D, Hpad)
    grid = (Hpad // tn,)

    kernel = functools.partial(_fc_bn_relu_dropout_kernel, eps=eps,
                               keep_threshold=keep_threshold,
                               apply_dropout=apply_dropout,
                               use_bf16_mxu=use_bf16_mxu)

    out_padded = pl.pallas_call(
        kernel,
        out_shape=jax.ShapeDtypeStruct((N, Hpad), jnp.float32),
        grid=grid,
        in_specs=[
            pl.BlockSpec((N, D), lambda j: (0, 0)),     # x: resident, untiled
            pl.BlockSpec((tn, D), lambda j: (j, 0)),    # weight rows (H tile)
            pl.BlockSpec((1, tn), lambda j: (0, j)),    # bias
            pl.BlockSpec((1, tn), lambda j: (0, j)),    # gamma * scale
            pl.BlockSpec((1, tn), lambda j: (0, j)),    # beta * scale
            pl.BlockSpec((N, tn), lambda j: (0, j)),    # dropout bits
        ],
        out_specs=pl.BlockSpec((N, tn), lambda j: (0, j)),
        compiler_params=pltpu.CompilerParams(
            dimension_semantics=("parallel",),          # shard H tiles over TCs
            vmem_limit_bytes=32 * 1024 * 1024,          # safe on v5e/v6e/v7x
        ),
    )(x, w_p, b_p, g_p, be_p, bits)

    return out_padded[:, :H]
    # TODO(synk): BatchNorm1d running_mean/running_var updates (train-mode side
    # effect) are not produced; only the forward activation is computed.


if __name__ == "__main__":
    # Small shapes consistent with the module: batch=8, input_dim=32, hidden=32.
    N, input_dim, hidden_dims = 8, 32, 32
    drop_probability = 0.5

    key = jax.random.PRNGKey(0)
    kx, kw, kb, kd = jax.random.split(key, 4)

    x = jax.random.normal(kx, (N, input_dim), dtype=jnp.float32)

    # Deterministic parameter init (PyTorch Linear-style uniform bounds).
    bound = 1.0 / (input_dim ** 0.5)
    weight = jax.random.uniform(kw, (hidden_dims, input_dim),
                                minval=-bound, maxval=bound, dtype=jnp.float32)
    bias = jax.random.uniform(kb, (hidden_dims,),
                              minval=-bound, maxval=bound, dtype=jnp.float32)
    gamma = jnp.ones((hidden_dims,), dtype=jnp.float32)   # BatchNorm weight
    beta = jnp.zeros((hidden_dims,), dtype=jnp.float32)   # BatchNorm bias

    out = fc_bn_relu_dropout(x, weight, bias, gamma, beta, kd,
                             drop_p=drop_probability)
    jax.block_until_ready(out)
    assert out.shape == (N, hidden_dims)
    assert bool(jnp.all(jnp.isfinite(out)))
    print("KERNEL_OK")
</pallas_src>

<mosaic_0001>
module attributes {stable_mosaic.version = 11 : i64} {
  func.func @_fc_bn_relu_dropout_kernel(%arg0: i32, %arg1: memref<8x32xf32, #tpu.memory_space<vmem>>, %arg2: memref<128x32xf32, #tpu.memory_space<vmem>>, %arg3: memref<1x128xf32, #tpu.memory_space<vmem>>, %arg4: memref<1x128xf32, #tpu.memory_space<vmem>>, %arg5: memref<1x128xf32, #tpu.memory_space<vmem>>, %arg6: memref<8x128xi32, #tpu.memory_space<vmem>>, %arg7: memref<8x128xf32, #tpu.memory_space<vmem>>) attributes {dimension_semantics = [#tpu.dimension_semantics<parallel>], iteration_bounds = array<i64: 1>, scalar_prefetch = 0 : i64, scratch_operands = 0 : i64, tpu.core_type = #tpu.core_type<tc>, window_params = [{pipeline_mode = #tpu.pipeline_mode<synchronous>, transform_indices = @transform_0, window_bounds = array<i64: 8, 32>}, {transform_indices = @transform_1, window_bounds = array<i64: 128, 32>}, {transform_indices = @transform_2, window_bounds = array<i64: 1, 128>}, {transform_indices = @transform_3, window_bounds = array<i64: 1, 128>}, {transform_indices = @transform_4, window_bounds = array<i64: 1, 128>}, {transform_indices = @transform_5, window_bounds = array<i64: 8, 128>}, {transform_indices = @transform_6, window_bounds = array<i64: 8, 128>}]} {
    %c0 = arith.constant 0 : index
    %c0_0 = arith.constant 0 : index
    %0 = vector.load %arg1[%c0, %c0_0] : memref<8x32xf32, #tpu.memory_space<vmem>>, vector<8x32xf32>
    %c0_1 = arith.constant 0 : index
    %c0_2 = arith.constant 0 : index
    %1 = vector.load %arg2[%c0_1, %c0_2] : memref<128x32xf32, #tpu.memory_space<vmem>>, vector<128x32xf32>
    %2 = arith.truncf %0 : vector<8x32xf32> to vector<8x32xbf16>
    %3 = arith.truncf %1 : vector<128x32xf32> to vector<128x32xbf16>
    %cst = arith.constant dense<0.000000e+00> : vector<8x128xf32>
    %4 = tpu.matmul %2, %3, %cst {dimension_numbers = #tpu.dot_dimension_numbers<[1], [1], [0], [0], [0, 0, 1, 0], [], []>} : vector<8x32xbf16>, vector<128x32xbf16>, vector<8x128xf32> -> vector<8x128xf32>
    %c0_3 = arith.constant 0 : index
    %c0_4 = arith.constant 0 : index
    %5 = vector.load %arg3[%c0_3, %c0_4] : memref<1x128xf32, #tpu.memory_space<vmem>>, vector<1x128xf32>
    %6 = vector.broadcast %5 : vector<1x128xf32> to vector<8x128xf32>
    %7 = arith.addf %4, %6 : vector<8x128xf32>
    %cst_5 = arith.constant dense<0.000000e+00> : vector<128xf32>
    %8 = vector.multi_reduction <add>, %7, %cst_5 [0] : vector<8x128xf32> to vector<128xf32>
    %9 = vector.shape_cast %8 : vector<128xf32> to vector<1x128xf32>
    %10 = arith.mulf %7, %7 : vector<8x128xf32>
    %cst_6 = arith.constant dense<0.000000e+00> : vector<128xf32>
    %11 = vector.multi_reduction <add>, %10, %cst_6 [0] : vector<8x128xf32> to vector<128xf32>
    %12 = vector.shape_cast %11 : vector<128xf32> to vector<1x128xf32>
    %cst_7 = arith.constant 1.250000e-01 : f32
    %13 = vector.broadcast %cst_7 : f32 to vector<1x128xf32>
    %14 = arith.mulf %9, %13 : vector<1x128xf32>
    %cst_8 = arith.constant 1.250000e-01 : f32
    %15 = vector.broadcast %cst_8 : f32 to vector<1x128xf32>
    %16 = arith.mulf %12, %15 : vector<1x128xf32>
    %17 = arith.mulf %14, %14 : vector<1x128xf32>
    %18 = arith.subf %16, %17 : vector<1x128xf32>
    %cst_9 = arith.constant 0.000000e+00 : f32
    %19 = vector.broadcast %cst_9 : f32 to vector<1x128xf32>
    %20 = arith.maximumf %18, %19 : vector<1x128xf32>
    %21 = vector.broadcast %14 : vector<1x128xf32> to vector<8x128xf32>
    %22 = arith.subf %7, %21 : vector<8x128xf32>
    %cst_10 = arith.constant 9.99999974E-6 : f32
    %23 = vector.broadcast %cst_10 : f32 to vector<1x128xf32>
    %24 = arith.addf %20, %23 : vector<1x128xf32>
    %25 = math.rsqrt %24 : vector<1x128xf32>
    %26 = vector.broadcast %25 : vector<1x128xf32> to vector<8x128xf32>
    %27 = arith.mulf %22, %26 : vector<8x128xf32>
    %c0_11 = arith.constant 0 : index
    %c0_12 = arith.constant 0 : index
    %28 = vector.load %arg4[%c0_11, %c0_12] : memref<1x128xf32, #tpu.memory_space<vmem>>, vector<1x128xf32>
    %29 = vector.broadcast %28 : vector<1x128xf32> to vector<8x128xf32>
    %30 = arith.mulf %27, %29 : vector<8x128xf32>
    %c0_13 = arith.constant 0 : index
    %c0_14 = arith.constant 0 : index
    %31 = vector.load %arg5[%c0_13, %c0_14] : memref<1x128xf32, #tpu.memory_space<vmem>>, vector<1x128xf32>
    %32 = vector.broadcast %31 : vector<1x128xf32> to vector<8x128xf32>
    %33 = arith.addf %30, %32 : vector<8x128xf32>
    %cst_15 = arith.constant 0.000000e+00 : f32
    %34 = vector.broadcast %cst_15 : f32 to vector<8x128xf32>
    %35 = arith.maximumf %33, %34 : vector<8x128xf32>
    %c0_16 = arith.constant 0 : index
    %c0_17 = arith.constant 0 : index
    %36 = vector.load %arg6[%c0_16, %c0_17] : memref<8x128xi32, #tpu.memory_space<vmem>>, vector<8x128xi32>
    %c-2147483648_i32 = arith.constant -2147483648 : i32
    %37 = vector.broadcast %c-2147483648_i32 : i32 to vector<8x128xi32>
    %38 = arith.cmpi ult, %36, %37 : vector<8x128xi32>
    %cst_18 = arith.constant 0.000000e+00 : f32
    %39 = vector.broadcast %cst_18 : f32 to vector<8x128xf32>
    %40 = arith.select %38, %35, %39 : vector<8x128xi1>, vector<8x128xf32>
    %c0_19 = arith.constant 0 : index
    %c0_20 = arith.constant 0 : index
    %41 = vector.load %arg7[%c0_19, %c0_20] : memref<8x128xf32, #tpu.memory_space<vmem>>, vector<8x128xf32>
    tpu.vector_store %arg7[%c0_19, %c0_20], %40 {strides = array<i32>} : memref<8x128xf32, #tpu.memory_space<vmem>>, vector<8x128xf32>,
    return
  }
  func.func @transform_0(%arg0: i32) -> (i32, i32) {
    %c0_i32 = arith.constant 0 : i32
    %c0_i32_0 = arith.constant 0 : i32
    %c0_i32_1 = arith.constant 0 : i32
    return %c0_i32, %c0_i32_0 : i32, i32
  }
  func.func @transform_1(%arg0: i32) -> (i32, i32) {
    %c0_i32 = arith.constant 0 : i32
    %c0_i32_0 = arith.constant 0 : i32
    return %arg0, %c0_i32 : i32, i32
  }
  func.func @transform_2(%arg0: i32) -> (i32, i32) {
    %c0_i32 = arith.constant 0 : i32
    %c0_i32_0 = arith.constant 0 : i32
    return %c0_i32, %arg0 : i32, i32
  }
  func.func @transform_3(%arg0: i32) -> (i32, i32) {
    %c0_i32 = arith.constant 0 : i32
    %c0_i32_0 = arith.constant 0 : i32
    return %c0_i32, %arg0 : i32, i32
  }
  func.func @transform_4(%arg0: i32) -> (i32, i32) {
    %c0_i32 = arith.constant 0 : i32
    %c0_i32_0 = arith.constant 0 : i32
    return %c0_i32, %arg0 : i32, i32
  }
  func.func @transform_5(%arg0: i32) -> (i32, i32) {
    %c0_i32 = arith.constant 0 : i32
    %c0_i32_0 = arith.constant 0 : i32
    return %c0_i32, %arg0 : i32, i32
  }
  func.func @transform_6(%arg0: i32) -> (i32, i32) {
    %c0_i32 = arith.constant 0 : i32
    %c0_i32_0 = arith.constant 0 : i32
    return %c0_i32, %arg0 : i32, i32
  }
}

</mosaic_0001>

<bundles_post_ra>
// kernel: tpu_custom_call.1
= control target key start
LH: loop header
LB: loop body
LE: loop exit
PB: predicated region body
PF: predicated region fallthrough
CT: control target
= control target key end

     0   :  { %vm58_vm0 = vcmask 261120   ;;  %v245_v2 = vmov 0.0   ;;  %vm246_vm1 = vmmov 0   ;;  %s367_s0 = inlined_call_operand.vmem [shape: f32[8,32], index: 0, kind: input, shape index: {}]   ;;  %s368_s1 = inlined_call_operand.vmem [shape: f32[128,32], index: 1, kind: input, shape index: {}]   ;;  %s369_s2 = inlined_call_operand.vmem [shape: f32[1,128], index: 2, kind: input, shape index: {}]   ;;  %s370_s3 = inlined_call_operand.vmem [shape: f32[1,128], index: 3, kind: input, shape index: {}]   ;;  %s371_s4 = inlined_call_operand.vmem [shape: f32[1,128], index: 4, kind: input, shape index: {}]   ;;  %s372_s5 = inlined_call_operand.vmem [shape: u32[8,128], index: 5, kind: input, shape index: {}]   ;;  %s373_s6 = inlined_call_operand.hbm [shape: f32[8,128], index: 6, kind: output, shape index: {}]  }
   0x1   :  { %v26_v0 = vld [vmem:[%s368_s1] sm:$0xff]  ;;  %v27_v1 = vld [vmem:[%s368_s1 + $0x8] sm:$0xff]  ;;  %196 = vmatprep.subr.bf16.mxu0 %v245_v2  ;;  %212 = vmatprep.mubr.msk.bf16.mxu0 %vm246_vm1, %v245_v2  ;;  %v28_v4 = vld [vmem:[%s368_s1 + $0x10] sm:$0xff] }
   0x2   :  { %v43_v3 = vpack.c.bf16 %v27_v1, %v26_v0  ;;  %v29_v5 = vld [vmem:[%s368_s1 + $0x18] sm:$0xff] }
   0x3   :  { %v44_v7 = vpack.c.bf16 %v29_v5, %v28_v4 }
   0x4   :  { %v63_v6 = vsel %vm58_vm0, %v43_v3, 0 }
   0x5   :  { %197 = vmatpush3.bf16.xpose.msra.mxu0 %v63_v6 }
   0x6   :  { %198 = vmatprep.subr.bf16.mxu0 %v245_v2 }
   0x7   :  { %11 = vsyncpa [#allocation3], 0  ;;  %v66_v8 = vsel %vm58_vm0, %v44_v7, 0  ;;  %v30_v9 = vld [vmem:[%s368_s1 + $0x20] sm:$0xff]  ;;  %v31_v10 = vld [vmem:[%s368_s1 + $0x28] sm:$0xff]  ;;  %s247_s12 = smov [#allocation2]  }
   0x8   :  { %v45_v11 = vpack.c.bf16 %v31_v10, %v30_v9  ;;  %v32_v13 = vld [vmem:[%s368_s1 + $0x30] sm:$0xff]  ;;  %v33_v14 = vld [vmem:[%s368_s1 + $0x38] sm:$0xff]  ;;  %v34_v17 = vld [vmem:[%s368_s1 + $0x40] sm:$0xff]  ;;  %s175_s13 = sshll.u32 %s247_s12, 4  ;;  %s176_s13 = int_to_ptr.vmem [resolvable:$true] %s175_s13 }
   0x9   :  { %v46_v15 = vpack.c.bf16 %v33_v14, %v32_v13  ;;  %v35_v18 = vld [vmem:[%s368_s1 + $0x48] sm:$0xff]  ;;  %v36_v21 = vld [vmem:[%s368_s1 + $0x50] sm:$0xff]  ;;  %v37_v22 = vld [vmem:[%s368_s1 + $0x58] sm:$0xff]  ;;  %s221_s14 = scalar_lea.vmem %s176_s13, 128  ;;  %p226_p1 = scmp.lt.s32.totalorder %s176_s13, %s176_s13 }
   0xa   :  { %v69_v12 = vsel %vm58_vm0, %v45_v11, 0  ;;  %v47_v19 = vpack.c.bf16 %v35_v18, %v34_v17  ;;  %v48_v23 = vpack.c.bf16 %v37_v22, %v36_v21  ;;  %v38_v25 = vld [vmem:[%s368_s1 + $0x60] sm:$0xff]  ;;  %v39_v26 = vld [vmem:[%s368_s1 + $0x68] sm:$0xff]  ;;  %v40_v29 = vld [vmem:[%s368_s1 + $0x70] sm:$0xff]  ;;  %p222_p0 = scmp.ne.s32.totalorder %s176_s13, %s221_s14  ;;  %p227_p2 = scmp.lt.s32.totalorder %s221_s14, %s221_s14 }
   0xb   :  { %v72_v16 = vsel %vm58_vm0, %v46_v15, 0  ;;  %v49_v27 = vpack.c.bf16 %v39_v26, %v38_v25  ;;  %v41_v30 = vld [vmem:[%s368_s1 + $0x78] sm:$0xff]  ;;  %v25_v33 = vld [vmem:[%s367_s0] sm:$0xff] }
   0xc   :  { %v75_v20 = vsel %vm58_vm0, %v47_v19, 0  ;;  %v78_v24 = vsel %vm58_vm0, %v48_v23, 0  ;;  %v50_v31 = vpack.c.bf16 %v41_v30, %v40_v29  ;;  %v42_v34 = vpack.c.bf16 %v25_v33, %v25_v33  ;;  %v183_v35 = vld [vmem:[%s369_s2] ss:$0 sm:$0xff]  ;;  %p228_p3 = por %p227_p2, %p226_p1 }
   0xd   :  { %199 = vmatpush3.bf16.xpose.msra.mxu0 %v66_v8  ;;  %v81_v28 = vsel %vm58_vm0, %v49_v27, 0  ;;  %v185_v62 = vld [vmem:[%s370_s3] ss:$0 sm:$0xff] }
   0xe   :  { %200 = vmatprep.subr.bf16.mxu0 %v245_v2  ;;  %v84_v32 = vsel %vm58_vm0, %v50_v31, 0  ;;  %v186_v0 = vld [vmem:[%s371_s4] ss:$0 sm:$0xff]  ;;  %p229_p4 = pnand %p228_p3, %p222_p0 }
  0x15   :  { %201 = vmatpush3.bf16.xpose.msra.mxu0 %v69_v12 }
  0x16   :  { %202 = vmatprep.subr.bf16.mxu0 %v245_v2 }
  0x1d   :  { %203 = vmatpush3.bf16.xpose.msra.mxu0 %v72_v16 }
  0x1e   :  { %204 = vmatprep.subr.bf16.mxu0 %v245_v2 }
  0x25   :  { %205 = vmatpush3.bf16.xpose.msra.mxu0 %v75_v20 }
  0x26   :  { %206 = vmatprep.subr.bf16.mxu0 %v245_v2 }
  0x2d   :  { %207 = vmatpush3.bf16.xpose.msra.mxu0 %v78_v24 }
  0x2e   :  { %208 = vmatprep.subr.bf16.mxu0 %v245_v2 }
  0x35   :  { %209 = vmatpush3.bf16.xpose.msra.mxu0 %v81_v28 }
  0x36   :  { %210 = vmatprep.subr.bf16.mxu0 %v245_v2  ;;  %v165_v2 = vld [vmem:[%s372_s5] sm:$0xff] }
  0x37   :  { %vm166_vm2 = vcmp.lt.u32.totalorder %v165_v2, 2147483648 }
  0x3d   :  { %211 = vmatpush3.bf16.xpose.msra.mxu0 %v84_v32 }
  0x44   :  { %213 = vmatmul.mubr.msk.bf16.vlgmr.msra.gmra.mrb[0].mxu0 %vm58_vm0, %v42_v34 }
 0x117   :  { %v120_v36 = vpop.f32.mrb[0].mxu0 }
 0x118   :  { %v121_v37 = vadd.f32 %v183_v35, %v120_v36  ;;  %v214_v38 = vpop.f32.mrb[1].mxu0 }
 0x119   :  { %v123_v39 = vpop.f32.mrb[2].mxu0 }
 0x11a   :  { %v126_v40 = vrot.slane %v121_v37, 4  ;;  %v132_v41 = vmul.f32 %v121_v37, %v121_v37  ;;  %v215_v42 = vpop.f32.mrb[3].mxu0 }
 0x11c   :  { %v127_v43 = vadd.f32 %v126_v40, %v121_v37  ;;  %v133_v44 = vrot.slane %v132_v41, 4 }
 0x11e   :  { %v128_v45 = vrot.slane %v127_v43, 2  ;;  %v134_v46 = vadd.f32 %v133_v44, %v132_v41 }
 0x120   :  { %v129_v47 = vadd.f32 %v128_v45, %v127_v43  ;;  %v135_v48 = vrot.slane %v134_v46, 2 }
 0x122   :  { %v130_v49 = vrot.slane %v129_v47, 1  ;;  %v136_v50 = vadd.f32 %v135_v48, %v134_v46 }
 0x124   :  { %v131_v51 = vadd.f32 %v130_v49, %v129_v47  ;;  %v137_v52 = vrot.slane %v136_v50, 1 }
 0x126   :  { %v138_v53 = vadd.f32 %v137_v52, %v136_v50  ;;  %v139_v54 = vmul.f32 0.125, %v131_v51 }
 0x128   :  { %v140_v55 = vmul.f32 0.125, %v138_v53  ;;  %v141_v56 = vmul.f32 %v139_v54, %v139_v54  ;;  %v144_v60 = vsub.f32 %v121_v37, %v139_v54 }
 0x12a   :  { %v142_v57 = vsub.f32 %v140_v55, %v141_v56 }
 0x12c   :  { %v143_v58 = vmax.f32 %v142_v57, 0.0 }
 0x12e   :  { %v145_v59 = vadd.f32 1e-05, %v143_v58 }
 0x130   :  { %219 = vrsqrt.f32 %v145_v59 }
 0x13a   :  { %v220_v61 = vpop.eup %219 }
 0x13b   :  { %v147_v63 = vmul.f32 %v220_v61, %v144_v60 }
 0x13d   :  { %v155_v1 = vmul.f32 %v185_v62, %v147_v63 }
 0x13f   :  { %v163_v3 = vadd.f32 %v186_v0, %v155_v1 }
 0x141   :  { %v164_v4 = vmax.f32 %v163_v3, 0.0 }
 0x143   :  { %v167_v5 = vsel %vm166_vm2, %v164_v4, 0.0 }
 0x144   :  { %168 = vst [vmem:[#allocation2] sm:$0xff] %v167_v5 }
 0x145   :  { %232 = shalt.err (!%p229_p4)
}
 0x146   :  { %s233_s15 = scalar_lea.hbm %s373_s6, 128 }
 0x147   :  { %p234_p5 = scmp.ne.s32.totalorder %s373_s6, %s233_s15  ;;  %p237_p6 = scmp.lt.u32.totalorder %s233_s15, %s373_s6 }
 0x149   :  { %p239_p7 = pnand %p237_p6, %p234_p5 }
 0x14b   :  { %242 = shalt.err (!%p239_p7)
}
 0x14c   :  { %178 = dma.vmem_to_hbm [thread:$0]  %s176_s13, 128, %s373_s6, [#allocation3]  }
 0x14d   :  { %243 = dma.done.wait [#allocation3], 128  }
 0x14e   :  { %244 = vsyncadd [#allocation3], 4294967168 }
 0x14f   :  { %182 = vsyncpa [#allocation3], 1 }

</bundles_post_ra>
